<compile_context>
chip_gen: v7x
topology: tpu7x:2x2x1
jax: 0.10.0
libtpu: 0.0.40
codegen_flags: <defaults>
</compile_context>

<pallas_src>
import functools
import math

import jax
import jax.numpy as jnp
from jax.experimental import pallas as pl
from jax.experimental.pallas import tpu as pltpu

_MASK_VALUE = -1e30                    # finite "-inf": avoids exp(-inf - -inf) NaNs
_VMEM_LIMIT_BYTES = 32 * 1024 * 1024   # explicit scoped-VMEM budget, safe on v5e/v6e/v7x


def _compiler_params(dimension_semantics):
    return pltpu.CompilerParams(
        dimension_semantics=dimension_semantics,
        vmem_limit_bytes=_VMEM_LIMIT_BYTES,
    )


# ---------------------------------------------------------------------------
# Flash attention:  softmax((Q @ K^T) / sqrt(d_key)) @ V      (dropout = id)
# ---------------------------------------------------------------------------
def _flash_attention_kernel(q_ref, k_ref, v_ref, o_ref, m_ref, l_ref, acc_ref,
                            *, inv_scale, causal, tq, tk):
    q_i = pl.program_id(1)
    kv_i = pl.program_id(2)

    @pl.when(kv_i == 0)
    def _init():
        m_ref[...] = jnp.full_like(m_ref, _MASK_VALUE)
        l_ref[...] = jnp.zeros_like(l_ref)
        acc_ref[...] = jnp.zeros_like(acc_ref)

    def _accumulate():
        # Fold 1/sqrt(d_key) into q: O(tq*D) multiplies instead of O(tq*tk)
        # divides; Python-float scale keeps the native input dtype (no upcast).
        q = q_ref[...] * inv_scale                       # (tq, D)
        k = k_ref[...]                                   # (tk, D)
        v = v_ref[...]                                   # (tk, Dv)

        # Contract the last dim of both operands: MXU takes the transposed
        # operand directly, no k.T / XLU transpose.
        s = jax.lax.dot_general(q, k, (((1,), (1,)), ((), ())),
                                preferred_element_type=jnp.float32)  # (tq, tk)

        if causal:
            rows = q_i * tq + jax.lax.broadcasted_iota(jnp.int32, s.shape, 0)
            cols = kv_i * tk + jax.lax.broadcasted_iota(jnp.int32, s.shape, 1)
            s = jnp.where(cols <= rows, s, _MASK_VALUE)

        m_prev = m_ref[...]                              # (tq, 1)
        m_new = jnp.maximum(m_prev, jnp.max(s, axis=-1, keepdims=True))
        alpha = jnp.exp(m_prev - m_new)                  # (tq, 1)
        p = jnp.exp(s - m_new)                           # (tq, tk)

        l_ref[...] = alpha * l_ref[...] + jnp.sum(p, axis=-1, keepdims=True)
        acc_ref[...] = alpha * acc_ref[...] + jnp.dot(
            p.astype(v.dtype), v, preferred_element_type=jnp.float32)
        m_ref[...] = m_new

    if causal:
        # Skip KV tiles that lie entirely above the diagonal (fully masked).
        @pl.when(kv_i * tk <= q_i * tq + (tq - 1))
        def _():
            _accumulate()
    else:
        _accumulate()

    @pl.when(kv_i == pl.num_programs(2) - 1)
    def _finalize():
        inv_l = pl.reciprocal(l_ref[...], approx=True)   # EUP vrcp, ~free slot
        o_ref[...] = (acc_ref[...] * inv_l).astype(o_ref.dtype)


def flash_attention(query, key, value, *, d_key, drop_ratio=0.0, causal=False,
                    block_q=256, block_k=256):
    """Pallas equivalent of Attention(d_key, drop_ratio, causal)(q, k, v)."""
    # TODO(synk): training-mode dropout (pltpu.prng_seed / prng_random_bits);
    # eval-mode dropout is the identity, so drop_ratio is unused here.
    del drop_ratio
    b, lq, d = query.shape
    bk, lk, dk = key.shape
    bv, lv, dv = value.shape
    assert b == bk == bv and d == dk and lk == lv

    tq = min(block_q, lq)
    tk = min(block_k, lk)
    assert lq % tq == 0 and lk % tk == 0, "pad sequence length to the tile size"

    kernel = functools.partial(
        _flash_attention_kernel,
        inv_scale=1.0 / math.sqrt(d_key), causal=causal, tq=tq, tk=tk)

    return pl.pallas_call(
        kernel,
        out_shape=jax.ShapeDtypeStruct((b, lq, dv), query.dtype),
        grid=(b, lq // tq, lk // tk),
        in_specs=[
            pl.BlockSpec((None, tq, d), lambda bi, qi, ki: (bi, qi, 0)),
            pl.BlockSpec((None, tk, d), lambda bi, qi, ki: (bi, ki, 0)),
            pl.BlockSpec((None, tk, dv), lambda bi, qi, ki: (bi, ki, 0)),
        ],
        out_specs=pl.BlockSpec((None, tq, dv), lambda bi, qi, ki: (bi, qi, 0)),
        scratch_shapes=[
            pltpu.VMEM((tq, 1), jnp.float32),    # running max  m
            pltpu.VMEM((tq, 1), jnp.float32),    # running sum  l
            pltpu.VMEM((tq, dv), jnp.float32),   # f32 accumulator
        ],
        compiler_params=_compiler_params(("parallel", "parallel", "arbitrary")),
    )(query, key, value)


# ---------------------------------------------------------------------------
# Fused linear:  y = x @ W + b       (rows tiled, W/b resident per tile)
# ---------------------------------------------------------------------------
def _linear_kernel(x_ref, w_ref, b_ref, o_ref):
    y = jnp.dot(x_ref[...], w_ref[...], preferred_element_type=jnp.float32)
    o_ref[...] = (y + b_ref[...]).astype(o_ref.dtype)


def linear(x, w, b, *, block_rows=256):
    rows, d_in = x.shape
    d_out = w.shape[1]
    tr = min(block_rows, rows)
    assert rows % tr == 0
    return pl.pallas_call(
        _linear_kernel,
        out_shape=jax.ShapeDtypeStruct((rows, d_out), x.dtype),
        grid=(rows // tr,),
        in_specs=[
            pl.BlockSpec((tr, d_in), lambda i: (i, 0)),
            pl.BlockSpec((d_in, d_out), lambda i: (0, 0)),
            pl.BlockSpec((1, d_out), lambda i: (0, 0)),
        ],
        out_specs=pl.BlockSpec((tr, d_out), lambda i: (i, 0)),
        compiler_params=_compiler_params(("parallel",)),
    )(x, w, b.reshape(1, d_out))


# ---------------------------------------------------------------------------
# Fused feed-forward:  y = relu(x @ W1 + b1) @ W2 + b2
# ---------------------------------------------------------------------------
def _feedforward_kernel(x_ref, w1_ref, b1_ref, w2_ref, b2_ref, o_ref):
    h = jnp.dot(x_ref[...], w1_ref[...], preferred_element_type=jnp.float32)
    h = jnp.maximum(h + b1_ref[...], 0.0)
    y = jnp.dot(h.astype(x_ref.dtype), w2_ref[...],
                preferred_element_type=jnp.float32)
    o_ref[...] = (y + b2_ref[...]).astype(o_ref.dtype)


def feedforward(x, w1, b1, w2, b2, *, block_rows=256):
    rows, d_in = x.shape
    d_hidden = w1.shape[1]
    d_out = w2.shape[1]
    tr = min(block_rows, rows)
    assert rows % tr == 0
    return pl.pallas_call(
        _feedforward_kernel,
        out_shape=jax.ShapeDtypeStruct((rows, d_out), x.dtype),
        grid=(rows // tr,),
        in_specs=[
            pl.BlockSpec((tr, d_in), lambda i: (i, 0)),
            pl.BlockSpec((d_in, d_hidden), lambda i: (0, 0)),
            pl.BlockSpec((1, d_hidden), lambda i: (0, 0)),
            pl.BlockSpec((d_hidden, d_out), lambda i: (0, 0)),
            pl.BlockSpec((1, d_out), lambda i: (0, 0)),
        ],
        out_specs=pl.BlockSpec((tr, d_out), lambda i: (i, 0)),
        compiler_params=_compiler_params(("parallel",)),
    )(x, w1, b1.reshape(1, d_hidden), w2, b2.reshape(1, d_out))


# ---------------------------------------------------------------------------
# Fused residual + LayerNorm (torch semantics: unbiased std, eps added to std)
#   out = residual + gamma * (y - mean) / (std + eps) + beta
# ---------------------------------------------------------------------------
def _residual_layernorm_kernel(res_ref, y_ref, g_ref, b_ref, o_ref, *, eps):
    y = y_ref[...].astype(jnp.float32)
    d = y.shape[-1]
    mean = jnp.sum(y, axis=-1, keepdims=True) * (1.0 / d)
    c = y - mean
    var = jnp.sum(c * c, axis=-1, keepdims=True) * (1.0 / (d - 1))
    normed = g_ref[...] * (c / (jnp.sqrt(var) + eps)) + b_ref[...]
    o_ref[...] = (res_ref[...].astype(jnp.float32) + normed).astype(o_ref.dtype)


def residual_layernorm(residual, y, gamma, beta, *, eps=1e-6, block_rows=256):
    rows, d = residual.shape
    tr = min(block_rows, rows)
    assert rows % tr == 0
    kernel = functools.partial(_residual_layernorm_kernel, eps=eps)
    return pl.pallas_call(
        kernel,
        out_shape=jax.ShapeDtypeStruct((rows, d), residual.dtype),
        grid=(rows // tr,),
        in_specs=[
            pl.BlockSpec((tr, d), lambda i: (i, 0)),
            pl.BlockSpec((tr, d), lambda i: (i, 0)),
            pl.BlockSpec((1, d), lambda i: (0, 0)),
            pl.BlockSpec((1, d), lambda i: (0, 0)),
        ],
        out_specs=pl.BlockSpec((tr, d), lambda i: (i, 0)),
        compiler_params=_compiler_params(("parallel",)),
    )(residual, y, gamma.reshape(1, d), beta.reshape(1, d))


# ---------------------------------------------------------------------------
# Encoder wiring (wrapper-side glue)
# ---------------------------------------------------------------------------
def positional_encodings(seq_len, d_model, dtype):
    positions = jnp.arange(seq_len, dtype=jnp.float32)
    channels = jnp.arange(0, d_model, 2, dtype=jnp.float32) / d_model
    channels = 1.0 / (10000.0 ** channels)
    angles = positions[:, None] * channels[None, :]                  # (T, D/2)
    enc = jnp.stack((jnp.sin(angles), jnp.cos(angles)), axis=-1)     # (T, D/2, 2)
    return enc.reshape(seq_len, d_model).astype(dtype)


def split_heads(x, n_heads):      # (B, L, D) -> (B*H, L, D/H)
    b, l, d = x.shape
    x = x.reshape(b, l, n_heads, d // n_heads)
    return jnp.transpose(x, (0, 2, 1, 3)).reshape(b * n_heads, l, d // n_heads)


def merge_heads(x, n_heads):      # (B*H, L, Dh) -> (B, L, D)
    bh, l, dh = x.shape
    b = bh // n_heads
    x = x.reshape(b, n_heads, l, dh)
    return jnp.transpose(x, (0, 2, 1, 3)).reshape(b, l, n_heads * dh)


def encoder_layer(x, p, *, n_heads, d_model):
    b, l, d = x.shape
    x2 = x.reshape(b * l, d)

    # Multi-head self-attention sub-layer (residual + LayerNorm).
    q = linear(x2, *p["wq"]).reshape(b, l, d)
    k = linear(x2, *p["wk"]).reshape(b, l, d)
    v = linear(x2, *p["wv"]).reshape(b, l, d)
    # NOTE: the PyTorch EncoderLayer builds Attention(args.d_model, ...), so the
    # softmax scale is sqrt(d_model), not sqrt(head_dim).
    attn = flash_attention(split_heads(q, n_heads), split_heads(k, n_heads),
                           split_heads(v, n_heads), d_key=d_model)
    attn = linear(merge_heads(attn, n_heads).reshape(b * l, d), *p["wo"])
    x2 = residual_layernorm(x2, attn, p["ln1_g"], p["ln1_b"])

    # Feed-forward sub-layer (residual + LayerNorm).
    ff = feedforward(x2, *p["ff1"], *p["ff2"])
    x2 = residual_layernorm(x2, ff, p["ln2_g"], p["ln2_b"])
    return x2.reshape(b, l, d)


def encoder_forward(params, tokens, *, n_heads, d_model, drop_ratio=0.0):
    # TODO(synk): embedding row-gather could be a Pallas scalar-prefetch kernel
    # (pl.Element index_map); plain jnp.take is used here.
    # TODO(synk): dropout layers are identity (eval mode); drop_ratio unused.
    del drop_ratio
    x = jnp.take(params["embedding"] * math.sqrt(d_model), tokens, axis=0)
    _, l, d = x.shape
    x = x + positional_encodings(l, d, x.dtype)[None]
    encodings = []
    for p in params["layers"]:
        x = encoder_layer(x, p, n_heads=n_heads, d_model=d_model)
        encodings.append(x)
    return encodings


# ---------------------------------------------------------------------------
# Pure-JAX reference (mirrors the PyTorch semantics) and test harness
# ---------------------------------------------------------------------------
def _layernorm_ref(y, gamma, beta, eps=1e-6):
    mean = y.mean(-1, keepdims=True)
    var = jnp.sum((y - mean) ** 2, axis=-1, keepdims=True) / (y.shape[-1] - 1)
    return gamma * (y - mean) / (jnp.sqrt(var) + eps) + beta


def _encoder_reference(params, tokens, *, n_heads, d_model):
    x = jnp.take(params["embedding"] * math.sqrt(d_model), tokens, axis=0)
    b, l, d = x.shape
    x = x + positional_encodings(l, d, x.dtype)[None]
    outs = []
    for p in params["layers"]:
        x2 = x.reshape(b * l, d)
        q = (x2 @ p["wq"][0] + p["wq"][1]).reshape(b, l, d)
        k = (x2 @ p["wk"][0] + p["wk"][1]).reshape(b, l, d)
        v = (x2 @ p["wv"][0] + p["wv"][1]).reshape(b, l, d)
        qh, kh, vh = (split_heads(t, n_heads) for t in (q, k, v))
        s = jnp.einsum("bqd,bkd->bqk", qh, kh) / math.sqrt(d_model)
        a = jax.nn.softmax(s, axis=-1)
        attn = jnp.einsum("bqk,bkd->bqd", a, vh)
        attn = merge_heads(attn, n_heads).reshape(b * l, d) @ p["wo"][0] + p["wo"][1]
        x2 = x2 + _layernorm_ref(attn, p["ln1_g"], p["ln1_b"])
        h = jnp.maximum(x2 @ p["ff1"][0] + p["ff1"][1], 0.0)
        ff = h @ p["ff2"][0] + p["ff2"][1]
        x2 = x2 + _layernorm_ref(ff, p["ln2_g"], p["ln2_b"])
        x = x2.reshape(b, l, d)
        outs.append(x)
    return outs


def init_params(key, *, vocab, d_model, d_hidden, n_layers):
    keys = jax.random.split(key, n_layers + 1)
    params = {
        "embedding": 0.05 * jax.random.normal(keys[0], (vocab, d_model), jnp.float32),
        "layers": [],
    }

    def dense(k, d_in, d_out):
        kw, kb = jax.random.split(k)
        w = jax.random.normal(kw, (d_in, d_out), jnp.float32) / math.sqrt(d_in)
        b = 0.01 * jax.random.normal(kb, (d_out,), jnp.float32)
        return w, b

    for lk in keys[1:]:
        ks = jax.random.split(lk, 6)
        params["layers"].append({
            "wq": dense(ks[0], d_model, d_model),
            "wk": dense(ks[1], d_model, d_model),
            "wv": dense(ks[2], d_model, d_model),
            "wo": dense(ks[3], d_model, d_model),
            "ff1": dense(ks[4], d_model, d_hidden),
            "ff2": dense(ks[5], d_hidden, d_model),
            "ln1_g": jnp.ones((d_model,), jnp.float32),
            "ln1_b": jnp.zeros((d_model,), jnp.float32),
            "ln2_g": jnp.ones((d_model,), jnp.float32),
            "ln2_b": jnp.zeros((d_model,), jnp.float32),
        })
    return params


if __name__ == "__main__":
    B, L = 2, 16
    VOCAB, D_MODEL, D_HIDDEN = 64, 256, 512
    N_HEADS, N_LAYERS = 2, 2          # head dim = 128 -> lane-dense attention output

    root = jax.random.PRNGKey(0)
    k_tok, k_par = jax.random.split(root)
    tokens = jax.random.randint(k_tok, (B, L), 0, VOCAB, dtype=jnp.int32)
    params = init_params(k_par, vocab=VOCAB, d_model=D_MODEL,
                         d_hidden=D_HIDDEN, n_layers=N_LAYERS)

    outs = encoder_forward(params, tokens, n_heads=N_HEADS, d_model=D_MODEL,
                           drop_ratio=0.1)
    outs = jax.block_until_ready(outs)

    refs = _encoder_reference(params, tokens, n_heads=N_HEADS, d_model=D_MODEL)
    assert len(outs) == N_LAYERS
    for got, want in zip(outs, refs):
        assert got.shape == (B, L, D_MODEL)
        max_err = float(jnp.max(jnp.abs(got - want)))
        assert jnp.allclose(got, want, atol=5e-2, rtol=5e-2), f"max abs err {max_err}"

    print("KERNEL_OK")
</pallas_src>

<mosaic_0001>
module attributes {stable_mosaic.version = 11 : i64} {
  func.func @_linear_kernel(%arg0: i32, %arg1: memref<32x256xf32, #tpu.memory_space<vmem>>, %arg2: memref<256x256xf32, #tpu.memory_space<vmem>>, %arg3: memref<1x256xf32, #tpu.memory_space<vmem>>, %arg4: memref<32x256xf32, #tpu.memory_space<vmem>>) attributes {dimension_semantics = [#tpu.dimension_semantics<parallel>], iteration_bounds = array<i64: 1>, scalar_prefetch = 0 : i64, scratch_operands = 0 : i64, tpu.core_type = #tpu.core_type<tc>, window_params = [{transform_indices = @transform_0, window_bounds = array<i64: 32, 256>}, {pipeline_mode = #tpu.pipeline_mode<synchronous>, transform_indices = @transform_1, window_bounds = array<i64: 256, 256>}, {pipeline_mode = #tpu.pipeline_mode<synchronous>, transform_indices = @transform_2, window_bounds = array<i64: 1, 256>}, {transform_indices = @transform_3, window_bounds = array<i64: 32, 256>}]} {
    %c0 = arith.constant 0 : index
    %c0_0 = arith.constant 0 : index
    %0 = vector.load %arg1[%c0, %c0_0] : memref<32x256xf32, #tpu.memory_space<vmem>>, vector<32x256xf32>
    %c0_1 = arith.constant 0 : index
    %c0_2 = arith.constant 0 : index
    %1 = vector.load %arg2[%c0_1, %c0_2] : memref<256x256xf32, #tpu.memory_space<vmem>>, vector<256x256xf32>
    %cst = arith.constant dense<0.000000e+00> : vector<32x256xf32>
    %2 = tpu.matmul %0, %1, %cst {dimension_numbers = #tpu.dot_dimension_numbers<[1], [0], [0], [1], [0, 0, 1, 1], [], []>} : vector<32x256xf32>, vector<256x256xf32>, vector<32x256xf32> -> vector<32x256xf32>
    %c0_3 = arith.constant 0 : index
    %c0_4 = arith.constant 0 : index
    %3 = vector.load %arg3[%c0_3, %c0_4] : memref<1x256xf32, #tpu.memory_space<vmem>>, vector<1x256xf32>
    %4 = vector.broadcast %3 : vector<1x256xf32> to vector<32x256xf32>
    %5 = arith.addf %2, %4 : vector<32x256xf32>
    %c0_5 = arith.constant 0 : index
    %c0_6 = arith.constant 0 : index
    %6 = vector.load %arg4[%c0_5, %c0_6] : memref<32x256xf32, #tpu.memory_space<vmem>>, vector<32x256xf32>
    tpu.vector_store %arg4[%c0_5, %c0_6], %5 {strides = array<i32>} : memref<32x256xf32, #tpu.memory_space<vmem>>, vector<32x256xf32>,
    return
  }
  func.func @transform_0(%arg0: i32) -> (i32, i32) {
    %c0_i32 = arith.constant 0 : i32
    %c0_i32_0 = arith.constant 0 : i32
    return %arg0, %c0_i32 : i32, i32
  }
  func.func @transform_1(%arg0: i32) -> (i32, i32) {
    %c0_i32 = arith.constant 0 : i32
    %c0_i32_0 = arith.constant 0 : i32
    %c0_i32_1 = arith.constant 0 : i32
    return %c0_i32, %c0_i32_0 : i32, i32
  }
  func.func @transform_2(%arg0: i32) -> (i32, i32) {
    %c0_i32 = arith.constant 0 : i32
    %c0_i32_0 = arith.constant 0 : i32
    %c0_i32_1 = arith.constant 0 : i32
    return %c0_i32, %c0_i32_0 : i32, i32
  }
  func.func @transform_3(%arg0: i32) -> (i32, i32) {
    %c0_i32 = arith.constant 0 : i32
    %c0_i32_0 = arith.constant 0 : i32
    return %arg0, %c0_i32 : i32, i32
  }
}

</mosaic_0001>

<bundles_post_ra>
// kernel: tpu_custom_call.1
= control target key start
LH: loop header
LB: loop body
LE: loop exit
PB: predicated region body
PF: predicated region fallthrough
CT: control target
= control target key end

     0   :  { %8 = vsyncpa [#allocation3], 0  ;;  %s488_s0 = inlined_call_operand.hbm [shape: f32[32,256], index: 0, kind: input, shape index: {}]   ;;  %s489_s1 = inlined_call_operand.hbm [shape: f32[256,256], index: 1, kind: input, shape index: {}]   ;;  %s490_s2 = inlined_call_operand.vmem [shape: f32[1,256], index: 2, kind: input, shape index: {}]   ;;  %s491_s3 = inlined_call_operand.hbm [shape: f32[32,256], index: 3, kind: output, shape index: {}]  }
   0x1   :  { %9 = vsyncpa [#allocation6], 0 }
   0x2   :  { %10 = vsyncpa [#allocation4], 0  ;;  %s415_s12 = smov [#allocation2]   ;;  %s343_s16 = scalar_lea.hbm %s488_s0, 1024 }
   0x3   :  { %s16_s13 = sshll.u32 %s415_s12, 4  ;;  %p344_p0 = scmp.ne.s32.totalorder %s488_s0, %s343_s16  ;;  %s17_s13 = int_to_ptr.vmem [resolvable:$true] %s16_s13 }
   0x4   :  { %p347_p1 = scmp.lt.u32.totalorder %s343_s16, %s488_s0 }
   0x6   :  { %p349_p2 = pnand %p347_p1, %p344_p0 }
   0x8   :  { %352 = shalt.err (!%p349_p2)
}
   0x9   :  { %s353_s21 = scalar_lea.vmem %s17_s13, 1024  ;;  %p358_p4 = scmp.lt.s32.totalorder %s17_s13, %s17_s13 }
   0xa   :  { %p354_p3 = scmp.ne.s32.totalorder %s17_s13, %s353_s21  ;;  %p359_p5 = scmp.lt.s32.totalorder %s353_s21, %s353_s21 }
   0xc   :  { %p360_p6 = por %p359_p5, %p358_p4 }
   0xe   :  { %p361_p7 = pnand %p360_p6, %p354_p3 }
  0x10   :  { %364 = shalt.err (!%p361_p7)
}
  0x11   :  { %s416_s22 = smov 256   ;;  %s417_s23 = smov 16  }
  0x12   :  { %22 = dma.hbm_to_vmem [thread:$0]  %s488_s0, 1024, %s17_s13, [#allocation3], %s416_s22, %s416_s22, %s417_s23  }
  0x13   :  { %s418_s26 = smov [#allocation5]   ;;  %s365_s30 = scalar_lea.hbm %s489_s1, 8192 }
  0x14   :  { %s28_s27 = sshll.u32 %s418_s26, 4  ;;  %p366_p8 = scmp.ne.s32.totalorder %s489_s1, %s365_s30  ;;  %s29_s27 = int_to_ptr.vmem [resolvable:$true] %s28_s27 }
  0x15   :  { %p369_p9 = scmp.lt.u32.totalorder %s365_s30, %s489_s1 }
  0x17   :  { %p371_p10 = pnand %p369_p9, %p366_p8 }
  0x19   :  { %374 = shalt.err (!%p371_p10)
}
  0x1a   :  { %s375_s8 = scalar_lea.vmem %s29_s27, 8192  ;;  %p380_p12 = scmp.lt.s32.totalorder %s29_s27, %s29_s27 }
  0x1b   :  { %p376_p11 = scmp.ne.s32.totalorder %s29_s27, %s375_s8  ;;  %p381_p13 = scmp.lt.s32.totalorder %s375_s8, %s375_s8 }
  0x1d   :  { %p382_p0 = por %p381_p13, %p380_p12 }
  0x1f   :  { %p383_p1 = pnand %p382_p0, %p376_p11 }
  0x21   :  { %386 = shalt.err (!%p383_p1)
}
  0x22   :  { %34 = dma.hbm_to_vmem [thread:$0]  %s489_s1, 8192, %s29_s27, [#allocation6], %s416_s22, %s416_s22, %s417_s23  }
  0x23   :  { %409 = dma.done.wait [#allocation3], 1024  }
  0x24   :  { %410 = vsyncadd [#allocation3], 4294966272 }
  0x25   :  { %411 = dma.done.wait [#allocation6], 8192  }
  0x26   :  { %412 = vsyncadd [#allocation6], 4294959104  ;;  %v52_v0 = vld [vmem:[#allocation5 + $0x8] sm:$0xff]  ;;  %v54_v1 = vld [vmem:[#allocation5 + $0x18] sm:$0xff]  ;;  %s419_s11 = smov [#allocation7]  }
  0x27   :  { %v51_v2 = vld [vmem:[#allocation5] sm:$0xff]  ;;  %v242_v3 = vpack.c.bf16 %v54_v1, %v52_v0  ;;  %v53_v4 = vld [vmem:[#allocation5 + $0x10] sm:$0xff]  ;;  %v56_v5 = vld [vmem:[#allocation5 + $0x28] sm:$0xff]  ;;  %s229_s12 = sshll.u32 %s419_s11, 4  ;;  %s230_s12 = int_to_ptr.vmem [resolvable:$true] %s229_s12 }
  0x28   :  { %v58_v6 = vld [vmem:[#allocation5 + $0x38] sm:$0xff]  ;;  %v244_v7 = vpack.c.bf16 %v53_v4, %v51_v2  ;;  %v55_v9 = vld [vmem:[#allocation5 + $0x20] sm:$0xff]  ;;  %v57_v10 = vld [vmem:[#allocation5 + $0x30] sm:$0xff]  ;;  %p392_p3 = scmp.lt.s32.totalorder %s230_s12, %s230_s12 }
  0x29   :  { %v246_v8 = vpack.c.bf16 %v58_v6, %v56_v5  ;;  %v60_v11 = vld [vmem:[#allocation5 + $0x48] sm:$0xff]  ;;  %243 = vmatprep.subr.bf16.mxu0 %v242_v3  ;;  %306 = vmatprep.subr.bf16.mxu1 %v242_v3  ;;  %v62_v12 = vld [vmem:[#allocation5 + $0x58] sm:$0xff]  ;;  %v248_v13 = vpack.c.bf16 %v57_v10, %v55_v9  ;;  %v59_v15 = vld [vmem:[#allocation5 + $0x40] sm:$0xff] }
  0x2a   :  { %245 = vmatpush1.bf16.msra.mxu0 %v244_v7  ;;  %322 = vmatpush1.bf16.msra.mxu1 %v244_v7  ;;  %v250_v14 = vpack.c.bf16 %v62_v12, %v60_v11  ;;  %v61_v16 = vld [vmem:[#allocation5 + $0x50] sm:$0xff]  ;;  %v64_v17 = vld [vmem:[#allocation5 + $0x68] sm:$0xff]  ;;  %v66_v18 = vld [vmem:[#allocation5 + $0x78] sm:$0xff] }
  0x2b   :  { %247 = vmatprep.subr.bf16.mxu0 %v246_v8  ;;  %307 = vmatprep.subr.bf16.mxu1 %v246_v8  ;;  %v252_v19 = vpack.c.bf16 %v61_v16, %v59_v15  ;;  %v254_v20 = vpack.c.bf16 %v66_v18, %v64_v17  ;;  %v63_v21 = vld [vmem:[#allocation5 + $0x60] sm:$0xff]  ;;  %v65_v22 = vld [vmem:[#allocation5 + $0x70] sm:$0xff]  ;;  %v68_v23 = vld [vmem:[#allocation5 + $0x88] sm:$0xff] }
  0x2c   :  { %v70_v24 = vld [vmem:[#allocation5 + $0x98] sm:$0xff]  ;;  %v256_v25 = vpack.c.bf16 %v65_v22, %v63_v21  ;;  %v67_v27 = vld [vmem:[#allocation5 + $0x80] sm:$0xff]  ;;  %v69_v28 = vld [vmem:[#allocation5 + $0x90] sm:$0xff] }
  0x2d   :  { %v258_v26 = vpack.c.bf16 %v70_v24, %v68_v23  ;;  %v72_v29 = vld [vmem:[#allocation5 + $0xa8] sm:$0xff]  ;;  %v74_v30 = vld [vmem:[#allocation5 + $0xb8] sm:$0xff]  ;;  %v260_v31 = vpack.c.bf16 %v69_v28, %v67_v27  ;;  %v71_v33 = vld [vmem:[#allocation5 + $0xa0] sm:$0xff] }
  0x2e   :  { %249 = vmatpush1.bf16.msra.mxu0 %v248_v13  ;;  %323 = vmatpush1.bf16.msra.mxu1 %v248_v13  ;;  %v262_v32 = vpack.c.bf16 %v74_v30, %v72_v29  ;;  %v73_v34 = vld [vmem:[#allocation5 + $0xb0] sm:$0xff]  ;;  %v76_v35 = vld [vmem:[#allocation5 + $0xc8] sm:$0xff]  ;;  %v78_v36 = vld [vmem:[#allocation5 + $0xd8] sm:$0xff] }
  0x2f   :  { %251 = vmatprep.subr.bf16.mxu0 %v250_v14  ;;  %308 = vmatprep.subr.bf16.mxu1 %v250_v14  ;;  %v264_v37 = vpack.c.bf16 %v73_v34, %v71_v33  ;;  %v75_v38 = vld [vmem:[#allocation5 + $0xc0] sm:$0xff]  ;;  %v266_v39 = vpack.c.bf16 %v78_v36, %v76_v35  ;;  %v77_v40 = vld [vmem:[#allocation5 + $0xd0] sm:$0xff]  ;;  %v44_v41 = vld [vmem:[#allocation2 + $0x8] sm:$0xff] }
  0x30   :  { %v48_v42 = vld [vmem:[#allocation2 + $0x28] sm:$0xff]  ;;  %v82_v44 = vld [vmem:[#allocation5 + $0xf8] sm:$0xff]  ;;  %191 = vmatprep.mubr.f32.mxu0 %v44_v41  ;;  %v268_v45 = vpack.c.bf16 %v77_v40, %v75_v38  ;;  %v79_v47 = vld [vmem:[#allocation5 + $0xe0] sm:$0xff]  ;;  %v117_v40 = vlaneseq }
  0x31   :  { %v80_v43 = vld [vmem:[#allocation5 + $0xe8] sm:$0xff]  ;;  %203 = vmatprep.mubr.f32.mxu1 %v48_v42  ;;  %v81_v48 = vld [vmem:[#allocation5 + $0xf0] sm:$0xff]  ;;  %v86_v50 = vld [vmem:[#allocation5 + $0x118] sm:$0xff] }
  0x32   :  { %253 = vmatpush1.bf16.msra.mxu0 %v252_v19  ;;  %324 = vmatpush1.bf16.msra.mxu1 %v252_v19  ;;  %v270_v46 = vpack.c.bf16 %v82_v44, %v80_v43  ;;  %v84_v49 = vld [vmem:[#allocation5 + $0x108] sm:$0xff]  ;;  %v272_v51 = vpack.c.bf16 %v81_v48, %v79_v47  ;;  %v83_v53 = vld [vmem:[#allocation5 + $0x100] sm:$0xff]  ;;  %v85_v54 = vld [vmem:[#allocation5 + $0x110] sm:$0xff]  ;;  %v118_v41 = vshrl.u32 %v117_v40, 7 }
  0x33   :  { %255 = vmatprep.subr.bf16.mxu0 %v254_v20  ;;  %309 = vmatprep.subr.bf16.mxu1 %v254_v20  ;;  %v274_v52 = vpack.c.bf16 %v86_v50, %v84_v49  ;;  %v88_v55 = vld [vmem:[#allocation5 + $0x128] sm:$0xff]  ;;  %v90_v56 = vld [vmem:[#allocation5 + $0x138] sm:$0xff]  ;;  %v276_v57 = vpack.c.bf16 %v85_v54, %v83_v53  ;;  %v87_v59 = vld [vmem:[#allocation5 + $0x120] sm:$0xff] }
  0x34   :  { %v278_v58 = vpack.c.bf16 %v90_v56, %v88_v55  ;;  %v89_v60 = vld [vmem:[#allocation5 + $0x130] sm:$0xff]  ;;  %v92_v61 = vld [vmem:[#allocation5 + $0x148] sm:$0xff]  ;;  %v94_v62 = vld [vmem:[#allocation5 + $0x158] sm:$0xff]  ;;  %v119_v42 = vsub.s32 0, %v118_v41  ;;  %v123_v44 = vsub.s32 1, %v118_v41 }
  0x35   :  { %v280_v63 = vpack.c.bf16 %v89_v60, %v87_v59  ;;  %v282_v0 = vpack.c.bf16 %v94_v62, %v92_v61  ;;  %v91_v1 = vld [vmem:[#allocation5 + $0x140] sm:$0xff]  ;;  %v93_v2 = vld [vmem:[#allocation5 + $0x150] sm:$0xff]  ;;  %v96_v3 = vld [vmem:[#allocation5 + $0x168] sm:$0xff] }
  0x36   :  { %257 = vmatpush1.bf16.msra.mxu0 %v256_v25  ;;  %325 = vmatpush1.bf16.msra.mxu1 %v256_v25  ;;  %v98_v4 = vld [vmem:[#allocation5 + $0x178] sm:$0xff]  ;;  %v284_v5 = vpack.c.bf16 %v93_v2, %v91_v1  ;;  %v95_v7 = vld [vmem:[#allocation5 + $0x160] sm:$0xff]  ;;  %v97_v8 = vld [vmem:[#allocation5 + $0x170] sm:$0xff] }
  0x37   :  { %259 = vmatprep.subr.bf16.mxu0 %v258_v26  ;;  %310 = vmatprep.subr.bf16.mxu1 %v258_v26  ;;  %v286_v6 = vpack.c.bf16 %v98_v4, %v96_v3  ;;  %v100_v9 = vld [vmem:[#allocation5 + $0x188] sm:$0xff]  ;;  %v102_v10 = vld [vmem:[#allocation5 + $0x198] sm:$0xff]  ;;  %v288_v11 = vpack.c.bf16 %v97_v8, %v95_v7  ;;  %v99_v13 = vld [vmem:[#allocation5 + $0x180] sm:$0xff] }
  0x38   :  { %v290_v12 = vpack.c.bf16 %v102_v10, %v100_v9  ;;  %v101_v14 = vld [vmem:[#allocation5 + $0x190] sm:$0xff]  ;;  %v104_v15 = vld [vmem:[#allocation5 + $0x1a8] sm:$0xff]  ;;  %v106_v16 = vld [vmem:[#allocation5 + $0x1b8] sm:$0xff] }
  0x39   :  { %v292_v17 = vpack.c.bf16 %v101_v14, %v99_v13  ;;  %v294_v18 = vpack.c.bf16 %v106_v16, %v104_v15  ;;  %v103_v19 = vld [vmem:[#allocation5 + $0x1a0] sm:$0xff]  ;;  %v105_v20 = vld [vmem:[#allocation5 + $0x1b0] sm:$0xff]  ;;  %v108_v21 = vld [vmem:[#allocation5 + $0x1c8] sm:$0xff] }
  0x3a   :  { %261 = vmatpush1.bf16.msra.mxu0 %v260_v31  ;;  %326 = vmatpush1.bf16.msra.mxu1 %v260_v31  ;;  %v110_v22 = vld [vmem:[#allocation5 + $0x1d8] sm:$0xff]  ;;  %v296_v23 = vpack.c.bf16 %v105_v20, %v103_v19  ;;  %v107_v25 = vld [vmem:[#allocation5 + $0x1c0] sm:$0xff]  ;;  %v109_v26 = vld [vmem:[#allocation5 + $0x1d0] sm:$0xff] }
  0x3b   :  { %263 = vmatprep.subr.bf16.mxu0 %v262_v32  ;;  %311 = vmatprep.subr.bf16.mxu1 %v262_v32  ;;  %v298_v24 = vpack.c.bf16 %v110_v22, %v108_v21  ;;  %v112_v27 = vld [vmem:[#allocation5 + $0x1e8] sm:$0xff]  ;;  %v114_v28 = vld [vmem:[#allocation5 + $0x1f8] sm:$0xff]  ;;  %v300_v29 = vpack.c.bf16 %v109_v26, %v107_v25  ;;  %v111_v31 = vld [vmem:[#allocation5 + $0x1e0] sm:$0xff] }
  0x3c   :  { %v302_v30 = vpack.c.bf16 %v114_v28, %v112_v27  ;;  %v113_v32 = vld [vmem:[#allocation5 + $0x1f0] sm:$0xff]  ;;  %v43_v34 = vld [vmem:[#allocation2] sm:$0xff]  ;;  %v46_v36 = vld [vmem:[#allocation2 + $0x18] sm:$0xff] }
  0x3d   :  { %v304_v33 = vpack.c.bf16 %v113_v32, %v111_v31  ;;  %v47_v35 = vld [vmem:[#allocation2 + $0x20] sm:$0xff]  ;;  %v45_v38 = vld [vmem:[#allocation2 + $0x10] sm:$0xff] }
  0x3e   :  { %265 = vmatpush1.bf16.msra.mxu0 %v264_v37  ;;  %327 = vmatpush1.bf16.msra.mxu1 %v264_v37  ;;  %v50_v37 = vld [vmem:[#allocation2 + $0x38] sm:$0xff]  ;;  %v115_v43 = vld [vmem:[%s490_s2] sm:$0x3]  ;;  %s387_s2 = scalar_lea.vmem %s230_s12, 1024 }
  0x3f   :  { %267 = vmatprep.subr.bf16.mxu0 %v266_v39  ;;  %312 = vmatprep.subr.bf16.mxu1 %v266_v39  ;;  %v49_v39 = vld [vmem:[#allocation2 + $0x30] sm:$0xff]  ;;  %p388_p2 = scmp.ne.s32.totalorder %s230_s12, %s387_s2  ;;  %p393_p4 = scmp.lt.s32.totalorder %s387_s2, %s387_s2 }
  0x41   :  { %p394_p5 = por %p393_p4, %p392_p3 }
  0x42   :  { %269 = vmatpush1.bf16.msra.mxu0 %v268_v45  ;;  %328 = vmatpush1.bf16.msra.mxu1 %v268_v45  ;;  %v120_v45 = vrot.slane %v115_v43, %v119_v42 }
  0x43   :  { %271 = vmatprep.subr.bf16.mxu0 %v270_v46  ;;  %313 = vmatprep.subr.bf16.mxu1 %v270_v46  ;;  %v124_v46 = vrot.slane %v115_v43, %v123_v44  ;;  %p395_p6 = pnand %p394_p5, %p388_p2 }
  0x46   :  { %273 = vmatpush1.bf16.msra.mxu0 %v272_v51  ;;  %329 = vmatpush1.bf16.msra.mxu1 %v272_v51 }
  0x47   :  { %275 = vmatprep.subr.bf16.mxu0 %v274_v52  ;;  %314 = vmatprep.subr.bf16.mxu1 %v274_v52 }
  0x4a   :  { %277 = vmatpush1.bf16.msra.mxu0 %v276_v57  ;;  %330 = vmatpush1.bf16.msra.mxu1 %v276_v57 }
  0x4b   :  { %279 = vmatprep.subr.bf16.mxu0 %v278_v58  ;;  %315 = vmatprep.subr.bf16.mxu1 %v278_v58 }
  0x4e   :  { %281 = vmatpush1.bf16.msra.mxu0 %v280_v63  ;;  %331 = vmatpush1.bf16.msra.mxu1 %v280_v63 }
  0x4f   :  { %283 = vmatprep.subr.bf16.mxu0 %v282_v0  ;;  %316 = vmatprep.subr.bf16.mxu1 %v282_v0 }
  0x52   :  { %285 = vmatpush1.bf16.msra.mxu0 %v284_v5  ;;  %332 = vmatpush1.bf16.msra.mxu1 %v284_v5 }
  0x53   :  { %287 = vmatprep.subr.bf16.mxu0 %v286_v6  ;;  %317 = vmatprep.subr.bf16.mxu1 %v286_v6 }
  0x56   :  { %289 = vmatpush1.bf16.msra.mxu0 %v288_v11  ;;  %333 = vmatpush1.bf16.msra.mxu1 %v288_v11 }
  0x57   :  { %291 = vmatprep.subr.bf16.mxu0 %v290_v12  ;;  %318 = vmatprep.subr.bf16.mxu1 %v290_v12 }
  0x5a   :  { %293 = vmatpush1.bf16.msra.mxu0 %v292_v17  ;;  %334 = vmatpush1.bf16.msra.mxu1 %v292_v17 }
  0x5b   :  { %295 = vmatprep.subr.bf16.mxu0 %v294_v18  ;;  %319 = vmatprep.subr.bf16.mxu1 %v294_v18 }
  0x5e   :  { %297 = vmatpush1.bf16.msra.mxu0 %v296_v23  ;;  %335 = vmatpush1.bf16.msra.mxu1 %v296_v23 }
  0x5f   :  { %299 = vmatprep.subr.bf16.mxu0 %v298_v24  ;;  %320 = vmatprep.subr.bf16.mxu1 %v298_v24 }
  0x62   :  { %301 = vmatpush1.bf16.msra.mxu0 %v300_v29  ;;  %336 = vmatpush1.bf16.msra.mxu1 %v300_v29 }
  0x63   :  { %303 = vmatprep.subr.bf16.mxu0 %v302_v30  ;;  %321 = vmatprep.subr.bf16.mxu1 %v302_v30 }
  0x66   :  { %305 = vmatpush1.bf16.msra.mxu0 %v304_v33  ;;  %337 = vmatpush1.bf16.msra.mxu1 %v304_v33 }
  0x69   :  { %192 = vmatmul.mubr.f32.vlgmr.msra.gmra.mrb[0].mxu0 %v43_v34  ;;  %204 = vmatmul.mubr.f32.vlgmr.msra.gmra.mrb[0].mxu1 %v47_v35 }
  0x6a   :  { %197 = vmatprep.mubr.f32.mxu0 %v46_v36  ;;  %209 = vmatprep.mubr.f32.mxu1 %v50_v37 }
  0x6d   :  { %198 = vmatmul.mubr.f32.gmra.mrb[2].mxu0 %v45_v38  ;;  %210 = vmatmul.mubr.f32.gmra.mrb[2].mxu1 %v49_v39 }
 0x13c   :  { %v193_v47 = vpop.f32.mrb[0].mxu0  ;;  %v205_v48 = vpop.f32.mrb[0].mxu1 }
 0x13d   :  { %v194_v49 = vadd.f32 %v193_v47, %v120_v45  ;;  %v206_v50 = vadd.f32 %v205_v48, %v120_v45  ;;  %v195_v51 = vpop.f32.mrb[1].mxu0  ;;  %v207_v52 = vpop.f32.mrb[1].mxu1 }
 0x13e   :  { %v196_v53 = vadd.f32 %v195_v51, %v124_v46  ;;  %v208_v54 = vadd.f32 %v207_v52, %v124_v46 }
 0x13f   :  { %216 = vst [vmem:[#allocation7] sm:$0xff] %v194_v49  ;;  %220 = vst [vmem:[#allocation7 + $0x20] sm:$0xff] %v206_v50 }
 0x140   :  { %217 = vst [vmem:[#allocation7 + $0x8] sm:$0xff] %v196_v53  ;;  %221 = vst [vmem:[#allocation7 + $0x28] sm:$0xff] %v208_v54  ;;  %v199_v55 = vpop.f32.mrb[2].mxu0  ;;  %v211_v56 = vpop.f32.mrb[2].mxu1 }
 0x141   :  { %v200_v57 = vadd.f32 %v199_v55, %v120_v45  ;;  %v212_v58 = vadd.f32 %v211_v56, %v120_v45  ;;  %v201_v59 = vpop.f32.mrb[3].mxu0  ;;  %v213_v60 = vpop.f32.mrb[3].mxu1 }
 0x142   :  { %v202_v61 = vadd.f32 %v201_v59, %v124_v46  ;;  %v214_v62 = vadd.f32 %v213_v60, %v124_v46 }
 0x143   :  { %218 = vst [vmem:[#allocation7 + $0x10] sm:$0xff] %v200_v57  ;;  %222 = vst [vmem:[#allocation7 + $0x30] sm:$0xff] %v212_v58 }
 0x144   :  { %219 = vst [vmem:[#allocation7 + $0x18] sm:$0xff] %v202_v61  ;;  %223 = vst [vmem:[#allocation7 + $0x38] sm:$0xff] %v214_v62 }
 0x145   :  { %398 = shalt.err (!%p395_p6)
}
 0x146   :  { %s399_s15 = scalar_lea.hbm %s491_s3, 1024 }
 0x147   :  { %p400_p7 = scmp.ne.s32.totalorder %s491_s3, %s399_s15  ;;  %p403_p8 = scmp.lt.u32.totalorder %s399_s15, %s491_s3 }
 0x149   :  { %p405_p9 = pnand %p403_p8, %p400_p7 }
 0x14b   :  { %408 = shalt.err (!%p405_p9)
}
 0x14c   :  { %235 = dma.vmem_to_hbm [thread:$0]  %s230_s12, 1024, %s491_s3, [#allocation4], %s416_s22, %s416_s22, %s417_s23  }
 0x14d   :  { %413 = dma.done.wait [#allocation4], 1024  }
 0x14e   :  { %414 = vsyncadd [#allocation4], 4294966272 }
 0x14f   :  { %239 = vsyncpa [#allocation3], 1 }
 0x150   :  { %240 = vsyncpa [#allocation6], 1 }
 0x151   :  { %241 = vsyncpa [#allocation4], 1 }

</bundles_post_ra>
